<compile_context>
chip_gen: v7x
topology: tpu7x:2x2x1
jax: 0.10.0
libtpu: 0.0.40
codegen_flags: <defaults>
</compile_context>

<pallas_src>
import functools

import jax
import jax.numpy as jnp
from jax import lax
from jax.experimental import pallas as pl
from jax.experimental.pallas import tpu as pltpu


def _round_up(x, m):
    return (x + m - 1) // m * m


def _vmem_capacity_bytes():
    """Physical per-core VMEM; conservative fallback = v7x's 64 MiB."""
    try:
        info = pltpu.get_tpu_info()
        cap = int(getattr(info, "vmem_capacity_bytes", 0) or 0)
        if cap > 0:
            return cap
    except Exception:
        pass
    return 64 * 1024 * 1024


def _masked_ce_kernel(x_ref, tw_ref, out_ref, *, batch, block_b, n_class, chunk):
    """One batch tile: per-row weighted NLL via a chunked online logsumexp.

    x_ref  : (block_b, n_class) logits block, native dtype (cast per chunk).
    tw_ref : (block_b, 2) f32 block; col 0 = target index (as float),
             col 1 = weight[target] * mask.
    out_ref: (block_b, 1) f32 per-row weighted NLL (0 for masked/padded rows).
    """
    row0 = pl.program_id(0) * block_b
    rows = lax.broadcasted_iota(jnp.int32, (block_b, 1), 0) + row0
    row_valid = rows < batch                 # ragged tail rows hold garbage

    tw = tw_ref[...]
    tgt = tw[:, 0:1].astype(jnp.int32)       # exact for n_class < 2**24
    wm = jnp.where(row_valid, tw[:, 1:2], 0.0)   # zero weight on garbage rows

    def chunk_stats(c0, cw):
        # Load one lane chunk, zero garbage rows *before* exp (NaN*0 == NaN),
        # and gather the target logit from the raw (unshifted) values.
        xc = x_ref[:, c0:c0 + cw].astype(jnp.float32)
        xc = jnp.where(row_valid, xc, 0.0)
        col = lax.broadcasted_iota(jnp.int32, (block_b, cw), 1) + c0
        xt_c = jnp.sum(jnp.where(col == tgt, xc, 0.0), axis=1, keepdims=True)
        m_c = jnp.max(xc, axis=1, keepdims=True)
        return xc, xt_c, m_c

    # First chunk initializes the running (max, sum-exp, target-logit) state.
    cw0 = min(chunk, n_class)
    xc, xt, m = chunk_stats(0, cw0)
    s = jnp.sum(jnp.exp(xc - m), axis=1, keepdims=True)

    # Remaining chunks: online logsumexp (static, trace-time unrolled loop).
    c0 = cw0
    while c0 < n_class:
        cw = min(chunk, n_class - c0)
        xc, xt_c, m_c = chunk_stats(c0, cw)
        xt = xt + xt_c
        m_new = jnp.maximum(m, m_c)
        s = s * jnp.exp(m - m_new) + jnp.sum(jnp.exp(xc - m_new), axis=1,
                                             keepdims=True)
        m = m_new
        c0 += cw

    # TODO(synk): out-of-range / negative targets contribute `lse` silently
    # (PyTorch raises); targets are assumed to be valid class indices.
    lse = m + jnp.log(s)
    out_ref[...] = (lse - xt) * wm


@functools.partial(jax.jit, static_argnames=("block_b", "class_chunk"))
def masked_cross_entropy_loss(logits, target, mask, weight,
                              block_b=None, class_chunk=512):
    """logits (B, C) float, target (B,) int, mask (B,) bool, weight (C,) float."""
    b, c = logits.shape
    assert c < (1 << 24), "float-packed targets are exact only for C < 2**24"
    itemsize = jnp.dtype(logits.dtype).itemsize

    # Tiny (B,)-sized wrapper work: fold weight & mask, pack with the targets
    # into one (B, 2) f32 side input, and compute the denominator (it does not
    # need the logits at all).
    wm = weight.astype(jnp.float32)[target] * (mask != 0).astype(jnp.float32)
    den = jnp.sum(wm)
    tw = jnp.stack([target.astype(jnp.float32), wm], axis=1)    # (B, 2) f32

    # --- Tile sizing: per generation, temporaries + lane padding accounted ---
    phys_vmem = _vmem_capacity_bytes()
    vmem_limit = min(64 * 1024 * 1024, (phys_vmem * 3) // 4)
    budget = max(6 * 1024 * 1024, vmem_limit - 4 * 1024 * 1024)

    cc = c if c <= class_chunk else max(128, (class_chunk // 128) * 128)
    c_pad = _round_up(c, 128)
    cc_pad = _round_up(cc, 128)
    per_row = (2 * c_pad * itemsize       # logits block, double-buffered
               + 2 * 128 * 4              # (bb,2) side input, lane-padded, dbuf
               + 2 * 128 * 4              # (bb,1) output,     lane-padded, dbuf
               + 4 * cc_pad * 4           # ~4 chunk-wide f32 temporaries
               + 6 * 128 * 4)             # per-row carries (m, s, x_t, ...) slack
    mult = max(8, 32 // itemsize)         # sublane packing of the logits dtype
    cap = block_b if block_b is not None else 2048   # per-step-overhead plateau
    bb = max(mult, budget // per_row)
    bb = min(bb, cap, _round_up(b, mult))
    bb = max(mult, (bb // mult) * mult)
    n_tiles = (b + bb - 1) // bb
    # TODO(synk): if even `mult` rows of logits overflow VMEM (C ~ 1e6 f32), a
    # class-tile grid axis carrying the online-logsumexp state would be needed.

    kernel = functools.partial(_masked_ce_kernel, batch=b, block_b=bb,
                               n_class=c, chunk=cc)

    def _run(operands):
        x, tw_ = operands
        per_row = pl.pallas_call(
            kernel,
            out_shape=jax.ShapeDtypeStruct((n_tiles * bb, 1), jnp.float32),
            grid_spec=pltpu.PrefetchScalarGridSpec(
                num_scalar_prefetch=0,
                grid=(n_tiles,),
                in_specs=[
                    pl.BlockSpec((bb, c), lambda i: (i, 0)),   # logits, native dtype
                    pl.BlockSpec((bb, 2), lambda i: (i, 0)),   # packed target / wm
                ],
                out_specs=pl.BlockSpec((bb, 1), lambda i: (i, 0)),
            ),
            compiler_params=pltpu.CompilerParams(
                dimension_semantics=("parallel",),   # v7x: 2 TCs split the tiles
                vmem_limit_bytes=vmem_limit),
            cost_estimate=pl.CostEstimate(
                flops=5 * b * c,
                transcendentals=b * c + b,
                bytes_accessed=b * c * itemsize + b * 8 + n_tiles * bb * 4),
        )(x, tw_)
        return jnp.sum(per_row)          # padded / masked rows are exactly 0

    any_mask = jnp.any(mask != 0)
    # PyTorch early-out: skip the whole HBM stream when the loss is 0.0.
    num = lax.cond(any_mask, _run, lambda _: jnp.zeros((), jnp.float32),
                   (logits, tw))
    safe_den = jnp.where(any_mask, den, jnp.float32(1.0))
    return jnp.where(any_mask, num / safe_den, jnp.float32(0.0))


def _reference(logits, target, mask, weight):
    # Pure-JAX replica of F.cross_entropy(weight=, reduction='mean') on the
    # masked rows (with the all-false-mask early-out).
    logp = jax.nn.log_softmax(logits.astype(jnp.float32), axis=-1)
    b = logits.shape[0]
    picked = logp[jnp.arange(b), target]
    w_t = weight.astype(jnp.float32)[target]
    m = (mask != 0).astype(jnp.float32)
    num = jnp.sum(-picked * w_t * m)
    den = jnp.sum(w_t * m)
    return jnp.where(jnp.any(mask), num / jnp.where(jnp.any(mask), den, 1.0), 0.0)


if __name__ == "__main__":
    key = jax.random.PRNGKey(0)
    k1, k2, k3, k4, k5, k6, k7 = jax.random.split(key, 7)

    # Small (b, c) shapes consistent with the module's forward.
    B, C = 16, 32
    logits = jax.random.normal(k1, (B, C), dtype=jnp.float32)
    target = jax.random.randint(k2, (B,), 0, C, dtype=jnp.int32)
    mask = jax.random.bernoulli(k3, 0.6, (B,))
    weight = jax.random.uniform(k4, (C,), dtype=jnp.float32, minval=0.5, maxval=1.5)

    loss = jax.block_until_ready(
        masked_cross_entropy_loss(logits, target, mask, weight))
    ref = _reference(logits, target, mask, weight)
    assert jnp.allclose(loss, ref, rtol=1e-5, atol=1e-5), (loss, ref)

    # Ragged batch (50 % 16 != 0) with several row tiles + ragged class chunks
    # (200 = 128 + 72): exercises the in-kernel tail masking (no logits pad)
    # and the online-logsumexp chunk loop.
    B2, C2 = 50, 200
    logits2 = jax.random.normal(k5, (B2, C2), dtype=jnp.float32)
    target2 = jax.random.randint(k6, (B2,), 0, C2, dtype=jnp.int32)
    mask2 = jax.random.bernoulli(k7, 0.5, (B2,))
    weight2 = jax.random.uniform(k4, (C2,), dtype=jnp.float32, minval=0.5,
                                 maxval=1.5)
    loss2 = jax.block_until_ready(
        masked_cross_entropy_loss(logits2, target2, mask2, weight2,
                                  block_b=16, class_chunk=128))
    ref2 = _reference(logits2, target2, mask2, weight2)
    assert jnp.allclose(loss2, ref2, rtol=1e-5, atol=1e-5), (loss2, ref2)

    # Caller-supplied bf16 logits: streamed as bf16 (half the HBM traffic, no
    # wrapper-side cast pass), upcast to f32 inside the kernel.
    logits_bf16 = logits.astype(jnp.bfloat16)
    loss_bf16 = jax.block_until_ready(
        masked_cross_entropy_loss(logits_bf16, target, mask, weight))
    ref_bf16 = _reference(logits_bf16.astype(jnp.float32), target, mask, weight)
    assert jnp.allclose(loss_bf16, ref_bf16, rtol=1e-4, atol=1e-4), (loss_bf16,
                                                                     ref_bf16)

    # All-false mask: PyTorch early-out -> 0.0 (kernel skipped via lax.cond).
    zero_mask = jnp.zeros((B,), dtype=jnp.bool_)
    loss0 = jax.block_until_ready(
        masked_cross_entropy_loss(logits, target, zero_mask, weight))
    assert jnp.allclose(loss0, 0.0), loss0

    print("KERNEL_OK")
</pallas_src>

<mosaic_0001>
module attributes {stable_mosaic.version = 11 : i64} {
  func.func @_masked_ce_kernel(%arg0: i32, %arg1: memref<16x32xf32, #tpu.memory_space<vmem>>, %arg2: memref<16x2xf32, #tpu.memory_space<vmem>>, %arg3: memref<16x1xf32, #tpu.memory_space<vmem>>) attributes {dimension_semantics = [#tpu.dimension_semantics<parallel>], iteration_bounds = array<i64: 1>, scalar_prefetch = 0 : i64, scratch_operands = 0 : i64, tpu.core_type = #tpu.core_type<tc>, window_params = [{transform_indices = @transform_0, window_bounds = array<i64: 16, 32>}, {transform_indices = @transform_1, window_bounds = array<i64: 16, 2>}, {transform_indices = @transform_2, window_bounds = array<i64: 16, 1>}]} {
    %c16_i32 = arith.constant 16 : i32
    %0 = arith.muli %arg0, %c16_i32 : i32
    %1 = tpu.iota {dimensions = array<i32: 0>} : vector<16x1xi32>
    %2 = vector.broadcast %0 : i32 to vector<16x1xi32>
    %3 = arith.addi %1, %2 : vector<16x1xi32>
    %c16_i32_0 = arith.constant 16 : i32
    %4 = vector.broadcast %c16_i32_0 : i32 to vector<16x1xi32>
    %5 = arith.cmpi slt, %3, %4 : vector<16x1xi32>
    %c0 = arith.constant 0 : index
    %c0_1 = arith.constant 0 : index
    %6 = vector.load %arg2[%c0, %c0_1] : memref<16x2xf32, #tpu.memory_space<vmem>>, vector<16x2xf32>
    %7 = vector.extract_strided_slice %6 {offsets = [0, 0], sizes = [16, 1], strides = [1, 1]} : vector<16x2xf32> to vector<16x1xf32>
    %8 = arith.fptosi %7 : vector<16x1xf32> to vector<16x1xi32>
    %9 = vector.extract_strided_slice %6 {offsets = [0, 1], sizes = [16, 1], strides = [1, 1]} : vector<16x2xf32> to vector<16x1xf32>
    %cst = arith.constant 0.000000e+00 : f32
    %10 = vector.broadcast %cst : f32 to vector<16x1xf32>
    %11 = arith.select %5, %9, %10 : vector<16x1xi1>, vector<16x1xf32>
    %c0_2 = arith.constant 0 : index
    %c0_3 = arith.constant 0 : index
    %12 = vector.load %arg1[%c0_2, %c0_3] : memref<16x32xf32, #tpu.memory_space<vmem>>, vector<16x32xf32>
    %cst_4 = arith.constant 0.000000e+00 : f32
    %13 = vector.shape_cast %5 : vector<16x1xi1> to vector<16x1xi1>
    %14 = vector.broadcast %13 : vector<16x1xi1> to vector<16x32xi1>
    %15 = vector.broadcast %cst_4 : f32 to vector<16x32xf32>
    %16 = arith.select %14, %12, %15 : vector<16x32xi1>, vector<16x32xf32>
    %17 = tpu.iota {dimensions = array<i32: 1>} : vector<16x32xi32>
    %c0_i32 = arith.constant 0 : i32
    %18 = vector.broadcast %c0_i32 : i32 to vector<16x32xi32>
    %19 = arith.addi %17, %18 : vector<16x32xi32>
    %20 = vector.broadcast %8 : vector<16x1xi32> to vector<16x32xi32>
    %21 = arith.cmpi eq, %19, %20 : vector<16x32xi32>
    %cst_5 = arith.constant 0.000000e+00 : f32
    %22 = vector.broadcast %cst_5 : f32 to vector<16x32xf32>
    %23 = arith.select %21, %16, %22 : vector<16x32xi1>, vector<16x32xf32>
    %cst_6 = arith.constant dense<0.000000e+00> : vector<16xf32>
    %24 = vector.multi_reduction <add>, %23, %cst_6 [1] : vector<16x32xf32> to vector<16xf32>
    %25 = vector.shape_cast %24 : vector<16xf32> to vector<16x1xf32>
    %cst_7 = arith.constant dense<0xFF800000> : vector<16xf32>
    %26 = vector.multi_reduction <maximumf>, %16, %cst_7 [1] : vector<16x32xf32> to vector<16xf32>
    %27 = vector.shape_cast %26 : vector<16xf32> to vector<16x1xf32>
    %28 = vector.broadcast %27 : vector<16x1xf32> to vector<16x32xf32>
    %29 = arith.subf %16, %28 : vector<16x32xf32>
    %30 = math.exp %29 : vector<16x32xf32>
    %cst_8 = arith.constant dense<0.000000e+00> : vector<16xf32>
    %31 = vector.multi_reduction <add>, %30, %cst_8 [1] : vector<16x32xf32> to vector<16xf32>
    %32 = vector.shape_cast %31 : vector<16xf32> to vector<16x1xf32>
    %33 = math.log %32 : vector<16x1xf32>
    %34 = arith.addf %27, %33 : vector<16x1xf32>
    %35 = arith.subf %34, %25 : vector<16x1xf32>
    %36 = arith.mulf %35, %11 : vector<16x1xf32>
    %c0_9 = arith.constant 0 : index
    %c0_10 = arith.constant 0 : index
    %37 = vector.load %arg3[%c0_9, %c0_10] : memref<16x1xf32, #tpu.memory_space<vmem>>, vector<16x1xf32>
    tpu.vector_store %arg3[%c0_9, %c0_10], %36 {strides = array<i32>} : memref<16x1xf32, #tpu.memory_space<vmem>>, vector<16x1xf32>,
    return
  }
  func.func @transform_0(%arg0: i32) -> (i32, i32) {
    %c0_i32 = arith.constant 0 : i32
    %c0_i32_0 = arith.constant 0 : i32
    return %arg0, %c0_i32 : i32, i32
  }
  func.func @transform_1(%arg0: i32) -> (i32, i32) {
    %c0_i32 = arith.constant 0 : i32
    %c0_i32_0 = arith.constant 0 : i32
    return %arg0, %c0_i32 : i32, i32
  }
  func.func @transform_2(%arg0: i32) -> (i32, i32) {
    %c0_i32 = arith.constant 0 : i32
    %c0_i32_0 = arith.constant 0 : i32
    return %arg0, %c0_i32 : i32, i32
  }
}

</mosaic_0001>

<bundles_post_ra>
// kernel: branch_1_fun.1
= control target key start
LH: loop header
LB: loop body
LE: loop exit
PB: predicated region body
PF: predicated region fallthrough
CT: control target
= control target key end

     0   :  { %vm46_vm0 = vcmask 261120   ;;  %v112_v2 = vmov 0   ;;  %v34_v15 = vlaneseq  ;;  %vm89_vm3 = vcmask 7168   ;;  %s153_s0 = inlined_call_operand.vmem [shape: f32[16,32], index: 0, kind: input, shape index: {}]   ;;  %s154_s1 = inlined_call_operand.vmem [shape: f32[16,2], index: 1, kind: input, shape index: {}]   ;;  %s155_s2 = inlined_call_operand.vmem [shape: f32[16,1], index: 2, kind: output, shape index: {}]  }
   0x1   :  { %v26_v0 = vld [vmem:[%s153_s0] sm:$0xff]  ;;  %v27_v1 = vld [vmem:[%s153_s0 + $0x8] sm:$0xff]  ;;  %102 = vset.pattern.permute.xlu1 %v112_v2  ;;  %103 = vset.pattern.permute.xlu0 %v112_v2  ;;  %s113_s0 = smov 127  }
   0x2   :  { %v20_v3 = vld [vmem:[%s154_s1] sm:$0xff]  ;;  %v53_v4 = vsel %vm46_vm0, %v26_v0, -inf  ;;  %v21_v5 = vld [vmem:[%s154_s1 + $0x8] sm:$0xff]  ;;  %v56_v8 = vsel %vm46_vm0, %v27_v1, -inf  ;;  %v35_v19 = vand.u32 127, %v34_v15 }
   0x3   :  { %v96_v6 = vtrunc.f32 %v20_v3  ;;  %54 = vmax.xlane.f32.xlu0 %v53_v4  ;;  %v98_v7 = vtrunc.f32 %v21_v5 }
   0x5   :  { %v97_v9 = vcvt.f32.s32 %v96_v6  ;;  %v99_v10 = vcvt.f32.s32 %v98_v7 }
   0x7   :  { %37 = vperm.xlu1 %102, %v97_v9   ;;  %57 = vmax.xlane.f32.xlu0 %v56_v8 }
   0xb   :  { %40 = vperm.xlu1 %102, %v99_v10  }
  0x86   :  { %v38_v18 = vpop.permute.xlu1 %37 }
  0x87   :  { %vm42_vm1 = vcmp.eq.s32.totalorder %v35_v19, %v38_v18 }
  0x88   :  { %v44_v22 = vsel %vm42_vm1, %v26_v0, 0.0 }
  0x89   :  { %v47_v24 = vsel %vm46_vm0, %v44_v22, 0.0 }
  0x8a   :  { %v41_v20 = vpop.permute.xlu1 %40 }
  0x8b   :  { %vm43_vm2 = vcmp.eq.s32.totalorder %v35_v19, %v41_v20 }
  0x8c   :  { %v45_v26 = vsel %vm43_vm2, %v27_v1, 0.0 }
  0x8d   :  { %v50_v28 = vsel %vm46_vm0, %v45_v26, 0.0 }
  0x90   :  { %v55_v11 = vpop.xlane.xlu0 %54 }
  0x91   :  { %v59_v12 = vsub.f32 %v26_v0, %v55_v11 }
  0x93   :  { %v61_v13 = vmul.f32 1.442695, %v59_v12 }
  0x94   :  { %v58_v14 = vpop.xlane.xlu0 %57 }
  0x95   :  { %104 = vpow2.f32 %v61_v13  ;;  %v60_v16 = vsub.f32 %v27_v1, %v58_v14 }
  0x97   :  { %v63_v17 = vmul.f32 1.442695, %v60_v16 }
  0x99   :  { %106 = vpow2.f32 %v63_v17 }
  0x9f   :  { %v105_v21 = vpop.eup %104 }
  0xa0   :  { %v65_v23 = vsel %vm46_vm0, %v105_v21, 0.0 }
  0xa1   :  { %66 = vadd.xlane.f32.xlu0 %v65_v23 }
  0xa3   :  { %v107_v25 = vpop.eup %106 }
  0xa4   :  { %v68_v27 = vsel %vm46_vm0, %v107_v25, 0.0 }
  0xa5   :  { %69 = vadd.xlane.f32.xlu1 %v68_v27  ;;  %48 = vadd.xlane.f32.xlu0 %v47_v24 }
  0xa9   :  { %51 = vadd.xlane.f32.xlu0 %v50_v28 }
 0x12e   :  { %v67_v29 = vpop.xlane.xlu0 %66 }
 0x12f   :  { %108 = vlog2.f32 %v67_v29 }
 0x132   :  { %v70_v30 = vpop.xlane.xlu1 %69  ;;  %v49_v33 = vpop.xlane.xlu0 %48 }
 0x133   :  { %110 = vlog2.f32 %v70_v30 }
 0x136   :  { %v52_v40 = vpop.xlane.xlu0 %51 }
 0x139   :  { %v109_v31 = vpop.eup %108 }
 0x13a   :  { %v72_v32 = vmul.f32 0.6931472, %v109_v31 }
 0x13c   :  { %v75_v34 = vadd.f32 %v72_v32, %v55_v11 }
 0x13d   :  { %v111_v35 = vpop.eup %110 }
 0x13e   :  { %v74_v36 = vmul.f32 0.6931472, %v111_v35  ;;  %v77_v37 = vsub.f32 %v75_v34, %v49_v33 }
 0x140   :  { %v79_v38 = vmul.f32 %v77_v37, %v20_v3  ;;  %v76_v39 = vadd.f32 %v74_v36, %v58_v14 }
 0x142   :  { %v78_v41 = vsub.f32 %v76_v39, %v52_v40  ;;  %83 = vrot.lane.b32.xlu0 %v79_v38, %s113_s0 }
 0x144   :  { %v80_v42 = vmul.f32 %v78_v41, %v21_v5 }
 0x146   :  { %85 = vrot.lane.b32.xlu0 %v80_v42, %s113_s0 }
 0x1b4   :  { %v84_v43 = vpop.permute.xlu0 %83 }
 0x1b5   :  { %90 = vst.msk [vmem:[%s155_s2] sm:$0xff] %vm89_vm3, %v84_v43 }
 0x1b8   :  { %v86_v44 = vpop.permute.xlu0 %85 }
 0x1b9   :  { %91 = vst.msk [vmem:[%s155_s2 + $0x8] sm:$0xff] %vm89_vm3, %v86_v44 }

</bundles_post_ra>
